<compile_context>
chip_gen: v7x
topology: tpu7x:2x2x1
jax: 0.10.0
libtpu: 0.0.40
codegen_flags: <defaults>
</compile_context>

<pallas_src>
import functools

import jax
import jax.numpy as jnp
from jax.experimental import pallas as pl
from jax.experimental.pallas import tpu as pltpu

# ---------------------------------------------------------------------------
# Model dimensions (from the PyTorch module).
# ---------------------------------------------------------------------------
DIMS = [784, 128, 64, 9, 64, 128, 784]   # layer in/out chain
F_IN = 784


# ---------------------------------------------------------------------------
# Kernel
# ---------------------------------------------------------------------------
def autoencoder_kernel(x_ref,
                       w1, b1, w2, b2, w34, b34, w5, b5, w6, b6,
                       o_ref):
    """Fused auto-encoder forward over one (tile_b, 784) batch tile.

    Five MXU matmuls (bf16 operands, f32 accumulation); bias-add / ReLU on
    the VPU and sigmoid on the EUP, all in f32.  Everything stays resident
    in VMEM for the tile.
    """
    def dense(h, w_ref, b_ref, relu):
        y = jnp.dot(h, w_ref[...], preferred_element_type=jnp.float32) + b_ref[...]
        if relu:
            y = jnp.maximum(y, 0.0)
        return y

    h = x_ref[...].astype(jnp.bfloat16)                  # cast in-kernel (no wrapper pre-pass)
    h = dense(h, w1, b1, True).astype(jnp.bfloat16)      # 784 -> 128
    h = dense(h, w2, b2, True).astype(jnp.bfloat16)      # 128 -> 64
    h = dense(h, w34, b34, True).astype(jnp.bfloat16)    # 64 -> 64 (fused 64->9->64, no act between)
    h = dense(h, w5, b5, True).astype(jnp.bfloat16)      # 64 -> 128
    y = dense(h, w6, b6, False)                          # 128 -> 784
    o_ref[...] = jax.nn.sigmoid(y).astype(o_ref.dtype)


# ---------------------------------------------------------------------------
# Host-side parameter preparation: fuse w3@w4, cast weights to bf16.
# ---------------------------------------------------------------------------
def prepare_params(raw):
    """raw: (w1,b1,...,w6,b6) with w:(in,out) f32, b:(1,out) f32."""
    w1, b1, w2, b2, w3, b3, w4, b4, w5, b5, w6, b6 = raw

    # Valid fusion: the module has NO nonlinearity between Linear(64,9) and
    # Linear(9,64) (encoder output feeds the decoder's first Linear directly).
    w34 = w3 @ w4                         # (64, 64)
    b34 = b3 @ w4 + b4                    # (1, 64)

    bf = lambda w: w.astype(jnp.bfloat16)
    return (bf(w1), b1, bf(w2), b2, bf(w34), b34, bf(w5), b5, bf(w6), b6)


# ---------------------------------------------------------------------------
# Wrapper
# ---------------------------------------------------------------------------
@functools.partial(jax.jit, static_argnames=("block_b", "out_dtype"))
def autoencoder_forward(x, prepped, *, block_b=512, out_dtype=jnp.float32):
    """x: [B, 784] float32.  prepped: output of prepare_params()."""
    B, F = x.shape
    assert F == F_IN

    if B <= block_b:
        # Single grid step; full-extent batch dim is exempt from the /8 rule.
        tile_b, b_pad = B, B
    else:
        tile_b = block_b                              # multiple of 8
        b_pad = pl.cdiv(B, tile_b) * tile_b

    # Zero-copy input in the divisible-batch case; pad only the ragged tail.
    x_in = x if b_pad == B else jnp.pad(x, ((0, b_pad - B), (0, 0)))

    grid = (b_pad // tile_b,)

    # Input tile: raw f32, 784 wide (full-extent last dim — no /128 padding).
    in_specs = [pl.BlockSpec((tile_b, F_IN), lambda i: (i, 0))]
    for p in prepped:
        # Full-array block, same tile every grid step.  Bind ndim explicitly
        # (avoids the late-binding-lambda bug).
        in_specs.append(pl.BlockSpec(p.shape, lambda i, n=p.ndim: (0,) * n))

    out_spec = pl.BlockSpec((tile_b, F_IN), lambda i: (i, 0))

    out = pl.pallas_call(
        autoencoder_kernel,
        out_shape=jax.ShapeDtypeStruct((b_pad, F_IN), out_dtype),
        grid_spec=pltpu.PrefetchScalarGridSpec(
            num_scalar_prefetch=0,
            grid=grid,
            in_specs=in_specs,
            out_specs=out_spec,
        ),
        compiler_params=pltpu.CompilerParams(
            dimension_semantics=("parallel",)),
    )(x_in, *prepped)

    return out if b_pad == B else out[:B]


# ---------------------------------------------------------------------------
# Init + references
# ---------------------------------------------------------------------------
def init_params(key):
    """Deterministic PyTorch-style init: U(-1/sqrt(fan_in), 1/sqrt(fan_in))."""
    params = []
    for li in range(6):
        fan_in, fan_out = DIMS[li], DIMS[li + 1]
        key, kw, kb = jax.random.split(key, 3)
        bound = 1.0 / jnp.sqrt(float(fan_in))
        w = jax.random.uniform(kw, (fan_in, fan_out), jnp.float32,
                               minval=-bound, maxval=bound)
        b = jax.random.uniform(kb, (1, fan_out), jnp.float32,
                               minval=-bound, maxval=bound)
        params += [w, b]
    return tuple(params)


def reference_forward_f32(x, raw):
    """Plain f32 JAX reference matching the PyTorch module exactly."""
    h = x
    acts = [jax.nn.relu, jax.nn.relu, None, jax.nn.relu, jax.nn.relu,
            jax.nn.sigmoid]
    for li in range(6):
        w, b = raw[2 * li], raw[2 * li + 1]
        h = h @ w + b
        if acts[li] is not None:
            h = acts[li](h)
    return h


def reference_kernel_math(x, prepped):
    """Mirror of the kernel math (bf16 operands, f32 accum, fused w3@w4)."""
    w1, b1, w2, b2, w34, b34, w5, b5, w6, b6 = prepped

    def dense(h, w, b, relu):
        y = jnp.dot(h, w, preferred_element_type=jnp.float32) + b
        return jnp.maximum(y, 0.0) if relu else y

    h = x.astype(jnp.bfloat16)
    h = dense(h, w1, b1, True).astype(jnp.bfloat16)
    h = dense(h, w2, b2, True).astype(jnp.bfloat16)
    h = dense(h, w34, b34, True).astype(jnp.bfloat16)
    h = dense(h, w5, b5, True).astype(jnp.bfloat16)
    return jax.nn.sigmoid(dense(h, w6, b6, False))


# ---------------------------------------------------------------------------
# Demo / self-check (small deterministic shapes)
# ---------------------------------------------------------------------------
if __name__ == "__main__":
    key = jax.random.PRNGKey(0)
    kx, kp = jax.random.split(key)

    B = 16                                              # small demo batch
    x = jax.random.uniform(kx, (B, F_IN), jnp.float32)  # "image" in [0, 1)
    raw_params = init_params(kp)
    prepped = prepare_params(raw_params)

    out = autoencoder_forward(x, prepped)               # default block_b=512
    out = jax.block_until_ready(out)
    assert out.shape == (B, F_IN)

    # Tight check vs. a JAX reference doing the identical (bf16/fused) math.
    ref_exact = reference_kernel_math(x, prepped)
    assert jnp.allclose(out, ref_exact, atol=1e-3, rtol=1e-3), \
        "mismatch vs kernel-math reference"

    # Loose check vs. the full-f32 unfused PyTorch-equivalent forward
    # (differences come only from bf16 matmul operands / w3@w4 fusion).
    ref_f32 = reference_forward_f32(x, raw_params)
    assert float(jnp.max(jnp.abs(out - ref_f32))) < 5e-2, \
        "mismatch vs f32 reference beyond bf16 tolerance"

    print("KERNEL_OK")
</pallas_src>

<mosaic_0001>
module attributes {stable_mosaic.version = 11 : i64} {
  func.func @autoencoder_kernel(%arg0: i32, %arg1: memref<16x784xf32, #tpu.memory_space<vmem>>, %arg2: memref<784x128xbf16, #tpu.memory_space<vmem>>, %arg3: memref<1x128xf32, #tpu.memory_space<vmem>>, %arg4: memref<128x64xbf16, #tpu.memory_space<vmem>>, %arg5: memref<1x64xf32, #tpu.memory_space<vmem>>, %arg6: memref<64x64xbf16, #tpu.memory_space<vmem>>, %arg7: memref<1x64xf32, #tpu.memory_space<vmem>>, %arg8: memref<64x128xbf16, #tpu.memory_space<vmem>>, %arg9: memref<1x128xf32, #tpu.memory_space<vmem>>, %arg10: memref<128x784xbf16, #tpu.memory_space<vmem>>, %arg11: memref<1x784xf32, #tpu.memory_space<vmem>>, %arg12: memref<16x784xf32, #tpu.memory_space<vmem>>) attributes {dimension_semantics = [#tpu.dimension_semantics<parallel>], iteration_bounds = array<i64: 1>, scalar_prefetch = 0 : i64, scratch_operands = 0 : i64, tpu.core_type = #tpu.core_type<tc>, window_params = [{transform_indices = @transform_0, window_bounds = array<i64: 16, 784>}, {pipeline_mode = #tpu.pipeline_mode<synchronous>, transform_indices = @transform_1, window_bounds = array<i64: 784, 128>}, {pipeline_mode = #tpu.pipeline_mode<synchronous>, transform_indices = @transform_2, window_bounds = array<i64: 1, 128>}, {pipeline_mode = #tpu.pipeline_mode<synchronous>, transform_indices = @transform_3, window_bounds = array<i64: 128, 64>}, {pipeline_mode = #tpu.pipeline_mode<synchronous>, transform_indices = @transform_4, window_bounds = array<i64: 1, 64>}, {pipeline_mode = #tpu.pipeline_mode<synchronous>, transform_indices = @transform_5, window_bounds = array<i64: 64, 64>}, {pipeline_mode = #tpu.pipeline_mode<synchronous>, transform_indices = @transform_6, window_bounds = array<i64: 1, 64>}, {pipeline_mode = #tpu.pipeline_mode<synchronous>, transform_indices = @transform_7, window_bounds = array<i64: 64, 128>}, {pipeline_mode = #tpu.pipeline_mode<synchronous>, transform_indices = @transform_8, window_bounds = array<i64: 1, 128>}, {pipeline_mode = #tpu.pipeline_mode<synchronous>, transform_indices = @transform_9, window_bounds = array<i64: 128, 784>}, {pipeline_mode = #tpu.pipeline_mode<synchronous>, transform_indices = @transform_10, window_bounds = array<i64: 1, 784>}, {transform_indices = @transform_11, window_bounds = array<i64: 16, 784>}]} {
    %c0 = arith.constant 0 : index
    %c0_0 = arith.constant 0 : index
    %0 = vector.load %arg1[%c0, %c0_0] : memref<16x784xf32, #tpu.memory_space<vmem>>, vector<16x784xf32>
    %1 = arith.truncf %0 : vector<16x784xf32> to vector<16x784xbf16>
    %c0_1 = arith.constant 0 : index
    %c0_2 = arith.constant 0 : index
    %2 = vector.load %arg2[%c0_1, %c0_2] : memref<784x128xbf16, #tpu.memory_space<vmem>>, vector<784x128xbf16>
    %cst = arith.constant dense<0.000000e+00> : vector<16x128xf32>
    %3 = tpu.matmul %1, %2, %cst {dimension_numbers = #tpu.dot_dimension_numbers<[1], [0], [0], [1], [0, 0, 1, 1], [], []>} : vector<16x784xbf16>, vector<784x128xbf16>, vector<16x128xf32> -> vector<16x128xf32>
    %c0_3 = arith.constant 0 : index
    %c0_4 = arith.constant 0 : index
    %4 = vector.load %arg3[%c0_3, %c0_4] : memref<1x128xf32, #tpu.memory_space<vmem>>, vector<1x128xf32>
    %5 = vector.broadcast %4 : vector<1x128xf32> to vector<16x128xf32>
    %6 = arith.addf %3, %5 : vector<16x128xf32>
    %cst_5 = arith.constant 0.000000e+00 : f32
    %7 = vector.broadcast %cst_5 : f32 to vector<16x128xf32>
    %8 = arith.maximumf %6, %7 : vector<16x128xf32>
    %9 = arith.truncf %8 : vector<16x128xf32> to vector<16x128xbf16>
    %c0_6 = arith.constant 0 : index
    %c0_7 = arith.constant 0 : index
    %10 = vector.load %arg4[%c0_6, %c0_7] : memref<128x64xbf16, #tpu.memory_space<vmem>>, vector<128x64xbf16>
    %cst_8 = arith.constant dense<0.000000e+00> : vector<16x64xf32>
    %11 = tpu.matmul %9, %10, %cst_8 {dimension_numbers = #tpu.dot_dimension_numbers<[1], [0], [0], [1], [0, 0, 1, 1], [], []>} : vector<16x128xbf16>, vector<128x64xbf16>, vector<16x64xf32> -> vector<16x64xf32>
    %c0_9 = arith.constant 0 : index
    %c0_10 = arith.constant 0 : index
    %12 = vector.load %arg5[%c0_9, %c0_10] : memref<1x64xf32, #tpu.memory_space<vmem>>, vector<1x64xf32>
    %13 = vector.broadcast %12 : vector<1x64xf32> to vector<16x64xf32>
    %14 = arith.addf %11, %13 : vector<16x64xf32>
    %cst_11 = arith.constant 0.000000e+00 : f32
    %15 = vector.broadcast %cst_11 : f32 to vector<16x64xf32>
    %16 = arith.maximumf %14, %15 : vector<16x64xf32>
    %17 = arith.truncf %16 : vector<16x64xf32> to vector<16x64xbf16>
    %c0_12 = arith.constant 0 : index
    %c0_13 = arith.constant 0 : index
    %18 = vector.load %arg6[%c0_12, %c0_13] : memref<64x64xbf16, #tpu.memory_space<vmem>>, vector<64x64xbf16>
    %cst_14 = arith.constant dense<0.000000e+00> : vector<16x64xf32>
    %19 = tpu.matmul %17, %18, %cst_14 {dimension_numbers = #tpu.dot_dimension_numbers<[1], [0], [0], [1], [0, 0, 1, 1], [], []>} : vector<16x64xbf16>, vector<64x64xbf16>, vector<16x64xf32> -> vector<16x64xf32>
    %c0_15 = arith.constant 0 : index
    %c0_16 = arith.constant 0 : index
    %20 = vector.load %arg7[%c0_15, %c0_16] : memref<1x64xf32, #tpu.memory_space<vmem>>, vector<1x64xf32>
    %21 = vector.broadcast %20 : vector<1x64xf32> to vector<16x64xf32>
    %22 = arith.addf %19, %21 : vector<16x64xf32>
    %cst_17 = arith.constant 0.000000e+00 : f32
    %23 = vector.broadcast %cst_17 : f32 to vector<16x64xf32>
    %24 = arith.maximumf %22, %23 : vector<16x64xf32>
    %25 = arith.truncf %24 : vector<16x64xf32> to vector<16x64xbf16>
    %c0_18 = arith.constant 0 : index
    %c0_19 = arith.constant 0 : index
    %26 = vector.load %arg8[%c0_18, %c0_19] : memref<64x128xbf16, #tpu.memory_space<vmem>>, vector<64x128xbf16>
    %cst_20 = arith.constant dense<0.000000e+00> : vector<16x128xf32>
    %27 = tpu.matmul %25, %26, %cst_20 {dimension_numbers = #tpu.dot_dimension_numbers<[1], [0], [0], [1], [0, 0, 1, 1], [], []>} : vector<16x64xbf16>, vector<64x128xbf16>, vector<16x128xf32> -> vector<16x128xf32>
    %c0_21 = arith.constant 0 : index
    %c0_22 = arith.constant 0 : index
    %28 = vector.load %arg9[%c0_21, %c0_22] : memref<1x128xf32, #tpu.memory_space<vmem>>, vector<1x128xf32>
    %29 = vector.broadcast %28 : vector<1x128xf32> to vector<16x128xf32>
    %30 = arith.addf %27, %29 : vector<16x128xf32>
    %cst_23 = arith.constant 0.000000e+00 : f32
    %31 = vector.broadcast %cst_23 : f32 to vector<16x128xf32>
    %32 = arith.maximumf %30, %31 : vector<16x128xf32>
    %33 = arith.truncf %32 : vector<16x128xf32> to vector<16x128xbf16>
    %c0_24 = arith.constant 0 : index
    %c0_25 = arith.constant 0 : index
    %34 = vector.load %arg10[%c0_24, %c0_25] : memref<128x784xbf16, #tpu.memory_space<vmem>>, vector<128x784xbf16>
    %cst_26 = arith.constant dense<0.000000e+00> : vector<16x784xf32>
    %35 = tpu.matmul %33, %34, %cst_26 {dimension_numbers = #tpu.dot_dimension_numbers<[1], [0], [0], [1], [0, 0, 1, 1], [], []>} : vector<16x128xbf16>, vector<128x784xbf16>, vector<16x784xf32> -> vector<16x784xf32>
    %c0_27 = arith.constant 0 : index
    %c0_28 = arith.constant 0 : index
    %36 = vector.load %arg11[%c0_27, %c0_28] : memref<1x784xf32, #tpu.memory_space<vmem>>, vector<1x784xf32>
    %37 = vector.broadcast %36 : vector<1x784xf32> to vector<16x784xf32>
    %38 = arith.addf %35, %37 : vector<16x784xf32>
    %39 = arith.negf %38 : vector<16x784xf32>
    %40 = math.exp %39 : vector<16x784xf32>
    %cst_29 = arith.constant 1.000000e+00 : f32
    %41 = vector.broadcast %cst_29 : f32 to vector<16x784xf32>
    %42 = arith.addf %41, %40 : vector<16x784xf32>
    %43 = arith.divf %41, %42 : vector<16x784xf32>
    %c0_30 = arith.constant 0 : index
    %c0_31 = arith.constant 0 : index
    %44 = vector.load %arg12[%c0_30, %c0_31] : memref<16x784xf32, #tpu.memory_space<vmem>>, vector<16x784xf32>
    tpu.vector_store %arg12[%c0_30, %c0_31], %43 {strides = array<i32>} : memref<16x784xf32, #tpu.memory_space<vmem>>, vector<16x784xf32>,
    return
  }
  func.func @transform_0(%arg0: i32) -> (i32, i32) {
    %c0_i32 = arith.constant 0 : i32
    %c0_i32_0 = arith.constant 0 : i32
    return %arg0, %c0_i32 : i32, i32
  }
  func.func @transform_1(%arg0: i32) -> (i32, i32) {
    %c0_i32 = arith.constant 0 : i32
    %c0_i32_0 = arith.constant 0 : i32
    %c0_i32_1 = arith.constant 0 : i32
    return %c0_i32, %c0_i32_0 : i32, i32
  }
  func.func @transform_2(%arg0: i32) -> (i32, i32) {
    %c0_i32 = arith.constant 0 : i32
    %c0_i32_0 = arith.constant 0 : i32
    %c0_i32_1 = arith.constant 0 : i32
    return %c0_i32, %c0_i32_0 : i32, i32
  }
  func.func @transform_3(%arg0: i32) -> (i32, i32) {
    %c0_i32 = arith.constant 0 : i32
    %c0_i32_0 = arith.constant 0 : i32
    %c0_i32_1 = arith.constant 0 : i32
    return %c0_i32, %c0_i32_0 : i32, i32
  }
  func.func @transform_4(%arg0: i32) -> (i32, i32) {
    %c0_i32 = arith.constant 0 : i32
    %c0_i32_0 = arith.constant 0 : i32
    %c0_i32_1 = arith.constant 0 : i32
    return %c0_i32, %c0_i32_0 : i32, i32
  }
  func.func @transform_5(%arg0: i32) -> (i32, i32) {
    %c0_i32 = arith.constant 0 : i32
    %c0_i32_0 = arith.constant 0 : i32
    %c0_i32_1 = arith.constant 0 : i32
    return %c0_i32, %c0_i32_0 : i32, i32
  }
  func.func @transform_6(%arg0: i32) -> (i32, i32) {
    %c0_i32 = arith.constant 0 : i32
    %c0_i32_0 = arith.constant 0 : i32
    %c0_i32_1 = arith.constant 0 : i32
    return %c0_i32, %c0_i32_0 : i32, i32
  }
  func.func @transform_7(%arg0: i32) -> (i32, i32) {
    %c0_i32 = arith.constant 0 : i32
    %c0_i32_0 = arith.constant 0 : i32
    %c0_i32_1 = arith.constant 0 : i32
    return %c0_i32, %c0_i32_0 : i32, i32
  }
  func.func @transform_8(%arg0: i32) -> (i32, i32) {
    %c0_i32 = arith.constant 0 : i32
    %c0_i32_0 = arith.constant 0 : i32
    %c0_i32_1 = arith.constant 0 : i32
    return %c0_i32, %c0_i32_0 : i32, i32
  }
  func.func @transform_9(%arg0: i32) -> (i32, i32) {
    %c0_i32 = arith.constant 0 : i32
    %c0_i32_0 = arith.constant 0 : i32
    %c0_i32_1 = arith.constant 0 : i32
    return %c0_i32, %c0_i32_0 : i32, i32
  }
  func.func @transform_10(%arg0: i32) -> (i32, i32) {
    %c0_i32 = arith.constant 0 : i32
    %c0_i32_0 = arith.constant 0 : i32
    %c0_i32_1 = arith.constant 0 : i32
    return %c0_i32, %c0_i32_0 : i32, i32
  }
  func.func @transform_11(%arg0: i32) -> (i32, i32) {
    %c0_i32 = arith.constant 0 : i32
    %c0_i32_0 = arith.constant 0 : i32
    return %arg0, %c0_i32 : i32, i32
  }
}

</mosaic_0001>

<bundles_post_ra>
// kernel: autoencoder_forward.1
= control target key start
LH: loop header
LB: loop body
LE: loop exit
PB: predicated region body
PF: predicated region fallthrough
CT: control target
= control target key end

     0   :  { %v2131_v43 = vmov 0.0   ;;  %vm2132_vm0 = vmmov 0   ;;  %vm460_vm1 = vcmask 130048   ;;  %s2687_s0 = inlined_call_operand.vmem [shape: f32[16,784], index: 0, kind: input, shape index: {}]   ;;  %s2688_s1 = inlined_call_operand.vmem [shape: bf16[784,128], index: 1, kind: input, shape index: {}]   ;;  %s2689_s2 = inlined_call_operand.vmem [shape: f32[1,128], index: 2, kind: input, shape index: {}]   ;;  %s2690_s3 = inlined_call_operand.vmem [shape: bf16[128,64], index: 3, kind: input, shape index: {}]   ;;  %s2691_s4 = inlined_call_operand.vmem [shape: f32[1,64], index: 4, kind: input, shape index: {}]   ;;  %s2692_s5 = inlined_call_operand.vmem [shape: bf16[64,64], index: 5, kind: input, shape index: {}]   ;;  %s2693_s6 = inlined_call_operand.vmem [shape: f32[1,64], index: 6, kind: input, shape index: {}]   ;;  %s2694_s7 = inlined_call_operand.vmem [shape: bf16[64,128], index: 7, kind: input, shape index: {}]   ;;  %s2695_s8 = inlined_call_operand.vmem [shape: f32[1,128], index: 8, kind: input, shape index: {}]   ;;  %s2696_s9 = inlined_call_operand.vmem [shape: bf16[128,784], index: 9, kind: input, shape index: {}]   ;;  %s2697_s10 = inlined_call_operand.vmem [shape: f32[1,784], index: 10, kind: input, shape index: {}]   ;;  %s2698_s11 = inlined_call_operand.hbm [shape: f32[16,784], index: 11, kind: output, shape index: {}]  }
   0x1   :  { %v1906_v0 = vld [vmem:[%s2688_s1 + $0x40] sm:$0xff]   ;;  %v1910_v4 = vld [vmem:[%s2688_s1 + $0x48] sm:$0xff]   ;;  %v1914_v8 = vld [vmem:[%s2688_s1 + $0x50] sm:$0xff]  }
   0x2   :  { %v1907_v1 = vld [vmem:[%s2688_s1] sm:$0xff]   ;;  %1734 = vmatprep.subr.bf16.mxu0 %v1906_v0  ;;  %v1911_v5 = vld [vmem:[%s2688_s1 + $0x8] sm:$0xff]   ;;  %v1915_v9 = vld [vmem:[%s2688_s1 + $0x10] sm:$0xff]  }
   0x3   :  { %v1908_v2 = vld [vmem:[%s2688_s1 + $0xc0] sm:$0xff]   ;;  %1735 = vmatpush3.bf16.msra.mxu0 %v1907_v1  ;;  %v1912_v6 = vld [vmem:[%s2688_s1 + $0xc8] sm:$0xff]   ;;  %v1916_v10 = vld [vmem:[%s2688_s1 + $0xd0] sm:$0xff]  }
   0x4   :  { %v1909_v3 = vld [vmem:[%s2688_s1 + $0x80] sm:$0xff]   ;;  %1756 = vmatprep.subr.bf16.mxu1 %v1908_v2  ;;  %1736 = vmatprep.subr.bf16.mxu0 %v1910_v4  ;;  %v1913_v7 = vld [vmem:[%s2688_s1 + $0x88] sm:$0xff]   ;;  %v1917_v11 = vld [vmem:[%s2688_s1 + $0x90] sm:$0xff]  }
   0x5   :  { %1757 = vmatpush3.bf16.msra.mxu1 %v1909_v3  ;;  %v1918_v12 = vld [vmem:[%s2688_s1 + $0x58] sm:$0xff]   ;;  %v1922_v16 = vld [vmem:[%s2688_s1 + $0x60] sm:$0xff]   ;;  %v1926_v20 = vld [vmem:[%s2688_s1 + $0x68] sm:$0xff]  }
   0x6   :  { %1758 = vmatprep.subr.bf16.mxu1 %v1912_v6  ;;  %v1919_v13 = vld [vmem:[%s2688_s1 + $0x18] sm:$0xff]   ;;  %v1923_v17 = vld [vmem:[%s2688_s1 + $0x20] sm:$0xff]   ;;  %v1927_v21 = vld [vmem:[%s2688_s1 + $0x28] sm:$0xff]  }
   0x7   :  { %1737 = vmatpush3.bf16.msra.mxu0 %v1911_v5  ;;  %v1920_v14 = vld [vmem:[%s2688_s1 + $0xd8] sm:$0xff]   ;;  %v1924_v18 = vld [vmem:[%s2688_s1 + $0xe0] sm:$0xff]   ;;  %v1928_v22 = vld [vmem:[%s2688_s1 + $0xe8] sm:$0xff]  }
   0x8   :  { %1738 = vmatprep.subr.bf16.mxu0 %v1914_v8  ;;  %v1921_v15 = vld [vmem:[%s2688_s1 + $0x98] sm:$0xff]   ;;  %v1925_v19 = vld [vmem:[%s2688_s1 + $0xa0] sm:$0xff]   ;;  %v1929_v23 = vld [vmem:[%s2688_s1 + $0xa8] sm:$0xff]  }
   0x9   :  { %1759 = vmatpush3.bf16.msra.mxu1 %v1913_v7  ;;  %v1930_v24 = vld [vmem:[%s2688_s1 + $0x70] sm:$0xff]   ;;  %v1934_v28 = vld [vmem:[%s2688_s1 + $0x78] sm:$0xff]   ;;  %v41_v31 = vld [vmem:[%s2687_s0 + $0x8] sm:$0xff] }
   0xa   :  { %1760 = vmatprep.subr.bf16.mxu1 %v1916_v10  ;;  %v1931_v25 = vld [vmem:[%s2688_s1 + $0x30] sm:$0xff]   ;;  %v1935_v29 = vld [vmem:[%s2688_s1 + $0x38] sm:$0xff]   ;;  %v48_v32 = vld [vmem:[%s2687_s0 + $0x40] sm:$0xff] }
   0xb   :  { %1739 = vmatpush3.bf16.msra.mxu0 %v1915_v9  ;;  %v1932_v26 = vld [vmem:[%s2688_s1 + $0xf0] sm:$0xff]   ;;  %v1936_v30 = vld [vmem:[%s2688_s1 + $0xf8] sm:$0xff]   ;;  %v55_v33 = vpack.c.bf16 %v48_v32, %v41_v31  ;;  %v40_v35 = vld [vmem:[%s2687_s0] sm:$0xff] }
   0xc   :  { %1740 = vmatprep.subr.bf16.mxu0 %v1918_v12  ;;  %v1933_v27 = vld [vmem:[%s2688_s1 + $0xb0] sm:$0xff]   ;;  %v1937_v34 = vld [vmem:[%s2688_s1 + $0xb8] sm:$0xff]   ;;  %v1938_v38 = vld [vmem:[%s2688_s1 + $0x140] sm:$0xff]  }
   0xd   :  { %1761 = vmatpush3.bf16.msra.mxu1 %v1917_v11  ;;  %v47_v36 = vld [vmem:[%s2687_s0 + $0x38] sm:$0xff]  ;;  %496 = vmatprep.mubr.bf16.mxu0 %v55_v33  ;;  %v50_v40 = vld [vmem:[%s2687_s0 + $0x50] sm:$0xff]  ;;  %v1939_v42 = vld [vmem:[%s2688_s1 + $0x100] sm:$0xff]  }
   0xe   :  { %1762 = vmatprep.subr.bf16.mxu1 %v1920_v14  ;;  %v54_v37 = vpack.c.bf16 %v47_v36, %v40_v35  ;;  %v43_v39 = vld [vmem:[%s2687_s0 + $0x18] sm:$0xff]  ;;  %v42_v44 = vld [vmem:[%s2687_s0 + $0x10] sm:$0xff]  ;;  %v49_v45 = vld [vmem:[%s2687_s0 + $0x48] sm:$0xff] }
   0xf   :  { %1741 = vmatpush3.bf16.msra.mxu0 %v1919_v13  ;;  %v57_v41 = vpack.c.bf16 %v50_v40, %v43_v39  ;;  %v56_v46 = vpack.c.bf16 %v49_v45, %v42_v44  ;;  %v1940_v47 = vld [vmem:[%s2688_s1 + $0x148] sm:$0xff]   ;;  %v1942_v49 = vld [vmem:[%s2688_s1 + $0x150] sm:$0xff]   ;;  %v1944_v51 = vld [vmem:[%s2688_s1 + $0x158] sm:$0xff]  }
  0x10   :  { %1742 = vmatprep.subr.bf16.mxu0 %v1922_v16  ;;  %v1941_v48 = vld [vmem:[%s2688_s1 + $0x108] sm:$0xff]   ;;  %v1943_v50 = vld [vmem:[%s2688_s1 + $0x110] sm:$0xff]   ;;  %v1945_v52 = vld [vmem:[%s2688_s1 + $0x118] sm:$0xff]  }
  0x11   :  { %1763 = vmatpush3.bf16.msra.mxu1 %v1921_v15  ;;  %537 = vmatprep.mubr.bf16.mxu1 %v57_v41  ;;  %v1946_v53 = vld [vmem:[%s2688_s1 + $0x160] sm:$0xff]   ;;  %v1948_v55 = vld [vmem:[%s2688_s1 + $0x168] sm:$0xff]   ;;  %v1950_v59 = vld [vmem:[%s2688_s1 + $0x170] sm:$0xff]  }
  0x12   :  { %1764 = vmatprep.subr.bf16.mxu1 %v1924_v18  ;;  %v1947_v54 = vld [vmem:[%s2688_s1 + $0x120] sm:$0xff]   ;;  %v45_v57 = vld [vmem:[%s2687_s0 + $0x28] sm:$0xff]  ;;  %v46_v62 = vld [vmem:[%s2687_s0 + $0x30] sm:$0xff] }
  0x13   :  { %1743 = vmatpush3.bf16.msra.mxu0 %v1923_v17  ;;  %v1954_v56 = vld [vmem:[%s2688_s1 + $0x180] sm:$0xff]   ;;  %v1949_v58 = vld [vmem:[%s2688_s1 + $0x128] sm:$0xff]   ;;  %v1951_v1 = vld [vmem:[%s2688_s1 + $0x130] sm:$0xff]  }
  0x14   :  { %1744 = vmatprep.subr.bf16.mxu0 %v1926_v20  ;;  %v52_v60 = vld [vmem:[%s2687_s0 + $0x60] sm:$0xff]  ;;  %v53_v63 = vld [vmem:[%s2687_s0 + $0x68] sm:$0xff]  ;;  %v1952_v2 = vld [vmem:[%s2688_s1 + $0x178] sm:$0xff]  }
  0x15   :  { %1765 = vmatpush3.bf16.msra.mxu1 %v1925_v19  ;;  %v59_v61 = vpack.c.bf16 %v52_v60, %v45_v57  ;;  %v60_v0 = vpack.c.bf16 %v53_v63, %v46_v62  ;;  %v1953_v3 = vld [vmem:[%s2688_s1 + $0x138] sm:$0xff]   ;;  %v44_v4 = vld [vmem:[%s2687_s0 + $0x20] sm:$0xff] }
  0x16   :  { %1766 = vmatprep.subr.bf16.mxu1 %v1928_v22  ;;  %v51_v5 = vld [vmem:[%s2687_s0 + $0x58] sm:$0xff] }
  0x17   :  { %1745 = vmatpush3.bf16.msra.mxu0 %v1927_v21  ;;  %v58_v6 = vpack.c.bf16 %v51_v5, %v44_v4 }
  0x18   :  { %1746 = vmatprep.subr.bf16.mxu0 %v1930_v24 }
  0x19   :  { %1767 = vmatpush3.bf16.msra.mxu1 %v1929_v23 }
  0x1a   :  { %1768 = vmatprep.subr.bf16.mxu1 %v1932_v26 }
  0x1b   :  { %1747 = vmatpush3.bf16.msra.mxu0 %v1931_v25 }
  0x1c   :  { %1748 = vmatprep.subr.bf16.mxu0 %v1934_v28 }
  0x1d   :  { %1769 = vmatpush3.bf16.msra.mxu1 %v1933_v27 }
  0x1e   :  { %1770 = vmatprep.subr.bf16.mxu1 %v1936_v30 }
  0x1f   :  { %1749 = vmatpush3.bf16.msra.mxu0 %v1935_v29 }
  0x20   :  { %1778 = vmatprep.subr.bf16.mxu0 %v1938_v38 }
  0x21   :  { %1771 = vmatpush3.bf16.msra.mxu1 %v1937_v34 }
  0x22   :  { %1830 = vmatprep.subr.bf16.mxu1 %v2131_v43  ;;  %497 = vmatmul.mubr.bf16.vlgmr.msra.gmra.mrb[0].mxu0 %v54_v37 }
  0x23   :  { %1779 = vmatpush3.bf16.msra.mxu0 %v1939_v42  ;;  %578 = vmatprep.mubr.bf16.mxu0 %v59_v61 }
  0x24   :  { %538 = vmatmul.mubr.bf16.vlgmr.msra.gmra.mrb[0].mxu1 %v56_v46  ;;  %1780 = vmatprep.subr.bf16.mxu0 %v1940_v47 }
  0x25   :  { %1832 = vmatprep.mubr.msk.bf16.mxu1 %vm2132_vm0, %v2131_v43  ;;  %1831 = vmatpush3.bf16.msra.mxu1 %v1954_v56 }
  0x26   :  { %1836 = vmatprep.subr.bf16.mxu1 %v2131_v43 }
  0x27   :  { %1781 = vmatpush3.bf16.msra.mxu0 %v1941_v48 }
  0x28   :  { %1782 = vmatprep.subr.bf16.mxu0 %v1942_v49 }
  0x2b   :  { %1783 = vmatpush3.bf16.msra.mxu0 %v1943_v50 }
  0x2c   :  { %1784 = vmatprep.subr.bf16.mxu0 %v1944_v51  ;;  %1833 = vmatmul.mubr.msk.bf16.vlgmr.msra.gmra.mrb[4].mxu1 %vm460_vm1, %v60_v0 }
  0x2d   :  { %1852 = vmatprep.mubr.msk.bf16.mxu1 %vm2132_vm0, %v2131_v43 }
  0x2f   :  { %1785 = vmatpush3.bf16.msra.mxu0 %v1945_v52 }
  0x30   :  { %1786 = vmatprep.subr.bf16.mxu0 %v1946_v53 }
  0x33   :  { %1787 = vmatpush3.bf16.msra.mxu0 %v1947_v54 }
  0x34   :  { %1788 = vmatprep.subr.bf16.mxu0 %v1948_v55 }
  0x37   :  { %1789 = vmatpush3.bf16.msra.mxu0 %v1949_v58 }
  0x38   :  { %1790 = vmatprep.subr.bf16.mxu0 %v1950_v59 }
  0x3b   :  { %1791 = vmatpush3.bf16.msra.mxu0 %v1951_v1 }
  0x3c   :  { %1792 = vmatprep.subr.bf16.mxu0 %v1952_v2 }
  0x3f   :  { %1793 = vmatpush3.bf16.msra.mxu0 %v1953_v3 }
  0x40   :  { %1856 = vmatprep.subr.bf16.mxu0 %v2131_v43 }
  0x42   :  { %579 = vmatmul.mubr.bf16.vlgmr.msra.gmra.mrb[4].mxu0 %v58_v6 }
  0x43   :  { %1864 = vmatprep.mubr.msk.bf16.mxu0 %vm2132_vm0, %v2131_v43 }
  0x44   :  { %16 = vsyncpa [#allocation3], 0  ;;  %v1955_v7 = vld [vmem:[%s2690_s3] sm:$0xff]   ;;  %v1956_v8 = vld [vmem:[%s2690_s3 + $0x8] sm:$0xff]   ;;  %vm785_vm2 = vcmask 523264  }
  0x45   :  { %1837 = vmatpush3.bf16.msra.mxu1 %v1955_v7  ;;  %v1957_v9 = vld [vmem:[%s2690_s3 + $0x10] sm:$0xff]   ;;  %v1958_v10 = vld [vmem:[%s2690_s3 + $0x18] sm:$0xff]   ;;  %v1959_v11 = vld [vmem:[%s2690_s3 + $0x20] sm:$0xff]  }
  0x46   :  { %1838 = vmatprep.subr.bf16.mxu1 %v2131_v43  ;;  %v1960_v12 = vld [vmem:[%s2690_s3 + $0x28] sm:$0xff]   ;;  %v1961_v13 = vld [vmem:[%s2690_s3 + $0x30] sm:$0xff]   ;;  %v1962_v14 = vld [vmem:[%s2690_s3 + $0x38] sm:$0xff]  }
  0x47   :  { %v1963_v15 = vld [vmem:[%s2692_s5] sm:$0xff]   ;;  %v1964_v16 = vld [vmem:[%s2692_s5 + $0x8] sm:$0xff]   ;;  %v1965_v52 = vld [vmem:[%s2692_s5 + $0x10] sm:$0xff]  }
  0x48   :  { %1857 = vmatpush3.bf16.msra.mxu0 %v1963_v15  ;;  %v1592_v18 = vld [vmem:[%s2689_s2] ss:$0 sm:$0xff]  ;;  %v1966_v53 = vld [vmem:[%s2692_s5 + $0x18] sm:$0xff]   ;;  %v1968_v55 = vld [vmem:[%s2694_s7 + $0x8] sm:$0xff]  }
  0x49   :  { %1839 = vmatpush3.bf16.msra.mxu1 %v1956_v8  ;;  %1858 = vmatprep.subr.bf16.mxu0 %v2131_v43  ;;  %v1967_v54 = vld [vmem:[%s2694_s7] sm:$0xff]   ;;  %v1969_v2 = vld [vmem:[%s2694_s7 + $0x10] sm:$0xff]   ;;  %v1970_v3 = vld [vmem:[%s2694_s7 + $0x18] sm:$0xff]  }
  0x4a   :  { %1840 = vmatprep.subr.bf16.mxu1 %v2131_v43  ;;  %v1643_v56 = vld [vmem:[%s2691_s4] ss:$0 sm:$0xff]  ;;  %v1976_v6 = vld [vmem:[%s2696_s9 + $0xc] ss:$28 sps:$4 sm:$0xff]   ;;  %v1979_v7 = vld [vmem:[%s2696_s9 + $0x3c] ss:$28 sps:$4 sm:$0xff]  }
  0x4b   :  { %v1971_v4 = vld [vmem:[%s2696_s9] ss:$28 sps:$4 sm:$0xff]   ;;  %v1977_v8 = vld [vmem:[%s2696_s9 + $0x38] ss:$28 sps:$4 sm:$0xff]  }
  0x4c   :  { %1859 = vmatpush3.bf16.msra.mxu0 %v1964_v16  ;;  %v1973_v5 = vld [vmem:[%s2696_s9 + $0x4] ss:$28 sps:$4 sm:$0xff]   ;;  %v2003_v15 = vld [vmem:[%s2696_s9 + $0x11c] ss:$28 sps:$4 sm:$0xff]  }
  0x4d   :  { %1841 = vmatpush3.bf16.msra.mxu1 %v1957_v9  ;;  %1860 = vmatprep.subr.bf16.mxu0 %v2131_v43  ;;  %v1985_v9 = vld [vmem:[%s2696_s9 + $0x74] ss:$28 sps:$4 sm:$0xff]  }
  0x4e   :  { %1842 = vmatprep.subr.bf16.mxu1 %v2131_v43  ;;  %v2001_v16 = vld [vmem:[%s2696_s9 + $0x118] ss:$28 sps:$4 sm:$0xff]  }
  0x50   :  { %1861 = vmatpush3.bf16.msra.mxu0 %v1965_v52 }
  0x51   :  { %1843 = vmatpush3.bf16.msra.mxu1 %v1958_v10  ;;  %1862 = vmatprep.subr.bf16.mxu0 %v2131_v43  ;;  %v1983_v10 = vld [vmem:[%s2696_s9 + $0x70] ss:$28 sps:$4 sm:$0xff]  }
  0x52   :  { %1844 = vmatprep.subr.bf16.mxu1 %v2131_v43 }
  0x54   :  { %1863 = vmatpush3.bf16.msra.mxu0 %v1966_v53 }
  0x55   :  { %1845 = vmatpush3.bf16.msra.mxu1 %v1959_v11  ;;  %1308 = vmatprep.subr.bf16.mxu0 %v1973_v5  ;;  %v1991_v11 = vld [vmem:[%s2696_s9 + $0xac] ss:$28 sps:$4 sm:$0xff]   ;;  %v2034_v5 = vld [vmem:[%s2696_s9 + $0xc0] ss:$28 sps:$4 sm:$0xff]  }
  0x56   :  { %1846 = vmatprep.subr.bf16.mxu1 %v2131_v43 }
  0x59   :  { %1847 = vmatpush3.bf16.msra.mxu1 %v1960_v12  ;;  %v1989_v12 = vld [vmem:[%s2696_s9 + $0xa8] ss:$28 sps:$4 sm:$0xff]  }
  0x5a   :  { %1848 = vmatprep.subr.bf16.mxu1 %v2131_v43 }
  0x5d   :  { %1849 = vmatpush3.bf16.msra.mxu1 %v1961_v13  ;;  %v1997_v13 = vld [vmem:[%s2696_s9 + $0xe4] ss:$28 sps:$4 sm:$0xff]  }
  0x5e   :  { %1850 = vmatprep.subr.bf16.mxu1 %v2131_v43 }
  0x61   :  { %1851 = vmatpush3.bf16.msra.mxu1 %v1962_v14  ;;  %v1995_v14 = vld [vmem:[%s2696_s9 + $0xe0] ss:$28 sps:$4 sm:$0xff]  }
  0x62   :  { %1868 = vmatprep.subr.bf16.mxu1 %v2131_v43 }
  0xf5   :  { %v1750_v17 = vpop.f32.mrb[0].mxu0 }
  0xf6   :  { %v1751_v19 = vpop.f32.mrb[1].mxu0 }
  0xf7   :  { %v1752_v20 = vadd.f32 %v1751_v19, %v1750_v17  ;;  %v1753_v21 = vpop.f32.mrb[2].mxu0  ;;  %v1772_v22 = vpop.f32.mrb[0].mxu1  ;;  %v1652_v17 = vld [vmem:[%s2693_s6] ss:$0 sm:$0xff] }
  0xf8   :  { %v1754_v23 = vpop.f32.mrb[3].mxu0  ;;  %v1773_v26 = vpop.f32.mrb[1].mxu1 }
  0xf9   :  { %v499_v24 = vadd.f32 %v1752_v20, %v1592_v18  ;;  %v1755_v25 = vadd.f32 %v1754_v23, %v1753_v21  ;;  %v1774_v27 = vadd.f32 %v1773_v26, %v1772_v22  ;;  %v1775_v28 = vpop.f32.mrb[2].mxu1  ;;  %v1974_v26 = vld [vmem:[%s2696_s9 + $0x8] ss:$28 sps:$4 sm:$0xff]  }
  0xfa   :  { %v1776_v30 = vpop.f32.mrb[3].mxu1 }
  0xfb   :  { %v502_v29 = vadd.f32 %v1755_v25, %v1592_v18  ;;  %v540_v31 = vadd.f32 %v1774_v27, %v499_v24  ;;  %v1777_v32 = vadd.f32 %v1776_v30, %v1775_v28  ;;  %v1982_v28 = vld [vmem:[%s2696_s9 + $0x44] ss:$28 sps:$4 sm:$0xff]   ;;  %v1988_v30 = vld [vmem:[%s2696_s9 + $0x7c] ss:$28 sps:$4 sm:$0xff]  }
  0xfd   :  { %v543_v33 = vadd.f32 %v1777_v32, %v502_v29  ;;  %v1980_v29 = vld [vmem:[%s2696_s9 + $0x40] ss:$28 sps:$4 sm:$0xff]   ;;  %v1994_v32 = vld [vmem:[%s2696_s9 + $0xb4] ss:$28 sps:$4 sm:$0xff]  }
  0xff   :  { %v621_v34 = vpop.f32.mrb[4].mxu1 }
 0x100   :  { %v1834_v35 = vpop.f32.mrb[5].mxu1 }
 0x101   :  { %v624_v36 = vpop.f32.mrb[6].mxu1  ;;  %v1998_v35 = vld [vmem:[%s2696_s9 + $0xe8] ss:$28 sps:$4 sm:$0xff]  }
 0x102   :  { %v1835_v37 = vpop.f32.mrb[7].mxu1 }
 0x103   :  { %v2004_v37 = vld [vmem:[%s2696_s9 + $0x120] ss:$28 sps:$4 sm:$0xff]  }
 0x115   :  { %v1794_v38 = vpop.f32.mrb[4].mxu0 }
 0x116   :  { %v1795_v39 = vpop.f32.mrb[5].mxu0 }
 0x117   :  { %v1796_v40 = vadd.f32 %v1795_v39, %v1794_v38  ;;  %v1797_v41 = vpop.f32.mrb[6].mxu0  ;;  %v2009_v38 = vld [vmem:[%s2696_s9 + $0x154] ss:$28 sps:$4 sm:$0xff]   ;;  %v2012_v39 = vld [vmem:[%s2696_s9 + $0x15c] ss:$28 sps:$4 sm:$0xff]  }
 0x118   :  { %v1798_v42 = vpop.f32.mrb[7].mxu0 }
 0x119   :  { %v581_v44 = vadd.f32 %v1796_v40, %v540_v31  ;;  %v1799_v45 = vadd.f32 %v1798_v42, %v1797_v41  ;;  %v1986_v31 = vld [vmem:[%s2696_s9 + $0x78] ss:$28 sps:$4 sm:$0xff]   ;;  %v2007_v40 = vld [vmem:[%s2696_s9 + $0x150] ss:$28 sps:$4 sm:$0xff]  }
 0x11a   :  { %v2010_v41 = vld [vmem:[%s2696_s9 + $0x158] ss:$28 sps:$4 sm:$0xff]   ;;  %v2015_v42 = vld [vmem:[%s2696_s9 + $0x18c] ss:$28 sps:$4 sm:$0xff]  }
 0x11b   :  { %v622_v46 = vadd.f32 %v621_v34, %v581_v44  ;;  %v584_v47 = vadd.f32 %v1799_v45, %v543_v33  ;;  %v1992_v33 = vld [vmem:[%s2696_s9 + $0xb0] ss:$28 sps:$4 sm:$0xff]   ;;  %v2013_v45 = vld [vmem:[%s2696_s9 + $0x188] ss:$28 sps:$4 sm:$0xff]  }
 0x11c   :  { %v2000_v34 = vld [vmem:[%s2696_s9 + $0xec] ss:$28 sps:$4 sm:$0xff]   ;;  %v2018_v44 = vld [vmem:[%s2696_s9 + $0x194] ss:$28 sps:$4 sm:$0xff]  }
 0x11d   :  { %v625_v48 = vadd.f32 %v624_v36, %v584_v47  ;;  %v628_v49 = vmax.f32 %v622_v46, 0.0  ;;  %v2006_v36 = vld [vmem:[%s2696_s9 + $0x124] ss:$28 sps:$4 sm:$0xff]   ;;  %v2016_v46 = vld [vmem:[%s2696_s9 + $0x190] ss:$28 sps:$4 sm:$0xff]  }
 0x11e   :  { %v2021_v47 = vld [vmem:[%s2696_s9 + $0x14] ss:$28 sps:$4 sm:$0xff]  }
 0x11f   :  { %v629_v50 = vmax.f32 %v625_v48, 0.0  ;;  %v2133_v48 = vmov 0  }
 0x121   :  { %v630_v51 = vpack.c.bf16 %v629_v50, %v628_v49  ;;  %v1658_v49 = vld [vmem:[%s2695_s8] ss:$0 sm:$0xff] }
 0x123   :  { %1853 = vmatmul.mubr.bf16.vlgmr.msra.gmra.mrb[8].mxu1 %v630_v51 }
 0x124   :  { %1876 = vmatprep.mubr.msk.bf16.mxu1 %vm2132_vm0, %v2131_v43  ;;  %1869 = vmatpush3.bf16.msra.mxu1 %v1967_v54 }
 0x125   :  { %1870 = vmatprep.subr.bf16.mxu1 %v2131_v43 }
 0x128   :  { %1871 = vmatpush3.bf16.msra.mxu1 %v1968_v55 }
 0x129   :  { %1872 = vmatprep.subr.bf16.mxu1 %v2131_v43 }
 0x12c   :  { %1873 = vmatpush3.bf16.msra.mxu1 %v1969_v2  ;;  %v2030_v2 = vld [vmem:[%s2696_s9 + $0x88] ss:$28 sps:$4 sm:$0xff]  }
 0x12d   :  { %1874 = vmatprep.subr.bf16.mxu1 %v2131_v43 }
 0x130   :  { %1875 = vmatpush3.bf16.msra.mxu1 %v1970_v3  ;;  %v2033_v3 = vld [vmem:[%s2696_s9 + $0xbc] ss:$28 sps:$4 sm:$0xff]  }
 0x131   :  { %1351 = vmatprep.subr.bf16.mxu1 %v1976_v6  ;;  %v2037_v6 = vld [vmem:[%s2696_s9 + $0xf4] ss:$28 sps:$4 sm:$0xff]  }
 0x1f6   :  { %v736_v57 = vpop.f32.mrb[8].mxu1 }
 0x1f7   :  { %v737_v58 = vadd.f32 %v1643_v56, %v736_v57  ;;  %v1854_v59 = vpop.f32.mrb[9].mxu1 }
 0x1f8   :  { %v739_v60 = vpop.f32.mrb[10].mxu1  ;;  %v2022_v59 = vld [vmem:[%s2696_s9 + $0x18] ss:$28 sps:$4 sm:$0xff]  }
 0x1f9   :  { %v740_v61 = vadd.f32 %v1643_v56, %v739_v60  ;;  %v1855_v62 = vpop.f32.mrb[11].mxu1  ;;  %v743_v63 = vmax.f32 %v737_v58, 0.0  ;;  %v2019_v58 = vld [vmem:[%s2696_s9 + $0x10] ss:$28 sps:$4 sm:$0xff]  }
 0x1fa   :  { %v2023_v62 = vld [vmem:[%s2696_s9 + $0x48] ss:$28 sps:$4 sm:$0xff]  }
 0x1fb   :  { %v744_v0 = vmax.f32 %v740_v61, 0.0  ;;  %v2025_v61 = vld [vmem:[%s2696_s9 + $0x4c] ss:$28 sps:$4 sm:$0xff]  }
 0x1fd   :  { %v745_v1 = vpack.c.bf16 %v744_v0, %v743_v63  ;;  %v2026_v63 = vld [vmem:[%s2696_s9 + $0x50] ss:$28 sps:$4 sm:$0xff]   ;;  %v2029_v0 = vld [vmem:[%s2696_s9 + $0x84] ss:$28 sps:$4 sm:$0xff]  }
 0x1ff   :  { %1865 = vmatmul.mubr.msk.bf16.vlgmr.msra.gmra.mrb[8].mxu0 %vm785_vm2, %v745_v1  ;;  %v2027_v1 = vld [vmem:[%s2696_s9 + $0x80] ss:$28 sps:$4 sm:$0xff]  }
 0x200   :  { %1309 = vmatpush1.bf16.msra.mxu0 %v1971_v4  ;;  %1340 = vmatprep.mubr.bf16.mxu0 %v2133_v48  ;;  %v2031_v4 = vld [vmem:[%s2696_s9 + $0xb8] ss:$28 sps:$4 sm:$0xff]  }
 0x201   :  { %1310 = vmatprep.subr.bf16.mxu0 %v1979_v7  ;;  %v2035_v7 = vld [vmem:[%s2696_s9 + $0xf0] ss:$28 sps:$4 sm:$0xff]  }
 0x204   :  { %1311 = vmatpush1.bf16.msra.mxu0 %v1977_v8  ;;  %v2038_v8 = vld [vmem:[%s2696_s9 + $0xf8] ss:$28 sps:$4 sm:$0xff]  }
 0x205   :  { %1312 = vmatprep.subr.bf16.mxu0 %v1985_v9  ;;  %v2041_v9 = vld [vmem:[%s2696_s9 + $0x12c] ss:$28 sps:$4 sm:$0xff]  }
 0x208   :  { %1313 = vmatpush1.bf16.msra.mxu0 %v1983_v10  ;;  %v2039_v10 = vld [vmem:[%s2696_s9 + $0x128] ss:$28 sps:$4 sm:$0xff]  }
 0x209   :  { %1314 = vmatprep.subr.bf16.mxu0 %v1991_v11  ;;  %v2042_v11 = vld [vmem:[%s2696_s9 + $0x130] ss:$28 sps:$4 sm:$0xff]  }
 0x20c   :  { %1315 = vmatpush1.bf16.msra.mxu0 %v1989_v12  ;;  %v2045_v12 = vld [vmem:[%s2696_s9 + $0x164] ss:$28 sps:$4 sm:$0xff]  }
 0x20d   :  { %1316 = vmatprep.subr.bf16.mxu0 %v1997_v13  ;;  %v2043_v13 = vld [vmem:[%s2696_s9 + $0x160] ss:$28 sps:$4 sm:$0xff]  }
 0x210   :  { %1317 = vmatpush1.bf16.msra.mxu0 %v1995_v14  ;;  %v2046_v14 = vld [vmem:[%s2696_s9 + $0x168] ss:$28 sps:$4 sm:$0xff]  }
 0x211   :  { %1318 = vmatprep.subr.bf16.mxu0 %v2003_v15  ;;  %v2049_v15 = vld [vmem:[%s2696_s9 + $0x19c] ss:$28 sps:$4 sm:$0xff]  }
 0x214   :  { %1319 = vmatpush1.bf16.msra.mxu0 %v2001_v16  ;;  %v2047_v16 = vld [vmem:[%s2696_s9 + $0x198] ss:$28 sps:$4 sm:$0xff]  }
 0x215   :  { %1320 = vmatprep.subr.bf16.mxu0 %v2009_v38 }
 0x218   :  { %1321 = vmatpush1.bf16.msra.mxu0 %v2007_v40 }
 0x219   :  { %1322 = vmatprep.subr.bf16.mxu0 %v2015_v42 }
 0x21c   :  { %1323 = vmatpush1.bf16.msra.mxu0 %v2013_v45 }
 0x21d   :  { %1394 = vmatprep.subr.bf16.mxu0 %v2021_v47 }
 0x2d2   :  { %v823_v18 = vpop.f32.mrb[8].mxu0 }
 0x2d3   :  { %v824_v19 = vadd.f32 %v1652_v17, %v823_v18  ;;  %v1866_v20 = vpop.f32.mrb[9].mxu0  ;;  %v985_v18 = vlaneseq }
 0x2d4   :  { %v826_v21 = vpop.f32.mrb[10].mxu0 }
 0x2d5   :  { %v827_v22 = vadd.f32 %v1652_v17, %v826_v21  ;;  %v1867_v23 = vpop.f32.mrb[11].mxu0  ;;  %v830_v24 = vmax.f32 %v824_v19, 0.0  ;;  %v2050_v17 = vld [vmem:[%s2696_s9 + $0x1a0] ss:$28 sps:$4 sm:$0xff]   ;;  %v2652_v19 = vshrl.u32 %v985_v18, 7  ;;  %s2134_s9 = smov [#allocation2]  }
 0x2d7   :  { %v831_v25 = vmax.f32 %v827_v22, 0.0  ;;  %v987_v20 = vsub.s32 0, %v2652_v19  ;;  %v995_v21 = vsub.s32 2, %v2652_v19  ;;  %v2659_v22 = vld [vmem:[%s2697_s10] sm:$0x7f]  ;;  %v991_v23 = vsub.s32 1, %v2652_v19 }
 0x2d8   :  { %s1581_s10 = sshll.u32 %s2134_s9, 4  ;;  %s1582_s10 = int_to_ptr.vmem [resolvable:$true] %s1581_s10 }
 0x2d9   :  { %v832_v27 = vpack.c.bf16 %v831_v25, %v830_v24  ;;  %v988_v24 = vrot.slane %v2659_v22, %v987_v20  ;;  %v996_v25 = vrot.slane %v2659_v22, %v995_v21  ;;  %s2107_s7 = scalar_lea.vmem %s1582_s10, 1792  ;;  %p2112_p1 = scmp.lt.s32.totalorder %s1582_s10, %s1582_s10 }
 0x2da   :  { %p2108_p0 = scmp.ne.s32.totalorder %s1582_s10, %s2107_s7  ;;  %p2113_p2 = scmp.lt.s32.totalorder %s2107_s7, %s2107_s7 }
 0x2db   :  { %1877 = vmatmul.mubr.msk.bf16.vlgmr.msra.gmra.mrb[12].mxu1 %vm785_vm2, %v832_v27 }
 0x2dc   :  { %1352 = vmatpush1.bf16.msra.mxu1 %v1974_v26  ;;  %1383 = vmatprep.mubr.bf16.mxu1 %v2133_v48  ;;  %v992_v26 = vrot.slane %v2659_v22, %v991_v23  ;;  %p2114_p3 = por %p2113_p2, %p2112_p1 }
 0x2dd   :  { %1353 = vmatprep.subr.bf16.mxu1 %v1982_v28 }
 0x2de   :  { %p2115_p4 = pnand %p2114_p3, %p2108_p0 }
 0x2e0   :  { %1354 = vmatpush1.bf16.msra.mxu1 %v1980_v29 }
 0x2e1   :  { %1355 = vmatprep.subr.bf16.mxu1 %v1988_v30 }
 0x2e4   :  { %1356 = vmatpush1.bf16.msra.mxu1 %v1986_v31 }
 0x2e5   :  { %1357 = vmatprep.subr.bf16.mxu1 %v1994_v32 }
 0x2e8   :  { %1358 = vmatpush1.bf16.msra.mxu1 %v1992_v33 }
 0x2e9   :  { %1359 = vmatprep.subr.bf16.mxu1 %v2000_v34 }
 0x2ec   :  { %1360 = vmatpush1.bf16.msra.mxu1 %v1998_v35 }
 0x2ed   :  { %1361 = vmatprep.subr.bf16.mxu1 %v2006_v36 }
 0x2f0   :  { %1362 = vmatpush1.bf16.msra.mxu1 %v2004_v37 }
 0x2f1   :  { %1363 = vmatprep.subr.bf16.mxu1 %v2012_v39 }
 0x2f4   :  { %1364 = vmatpush1.bf16.msra.mxu1 %v2010_v41 }
 0x2f5   :  { %1365 = vmatprep.subr.bf16.mxu1 %v2018_v44 }
 0x2f8   :  { %1366 = vmatpush1.bf16.msra.mxu1 %v2016_v46 }
 0x2f9   :  { %1880 = vmatprep.subr.bf16.mxu1 %v2131_v43 }
 0x3ae   :  { %v909_v50 = vpop.f32.mrb[12].mxu1 }
 0x3af   :  { %v910_v51 = vadd.f32 %v1658_v49, %v909_v50  ;;  %v1878_v52 = vpop.f32.mrb[13].mxu1 }
 0x3b0   :  { %v912_v53 = vpop.f32.mrb[14].mxu1 }
 0x3b1   :  { %v913_v54 = vadd.f32 %v1658_v49, %v912_v53  ;;  %v1879_v55 = vpop.f32.mrb[15].mxu1  ;;  %v916_v56 = vmax.f32 %v910_v51, 0.0 }
 0x3b3   :  { %v917_v57 = vmax.f32 %v913_v54, 0.0 }
 0x3b5   :  { %v918_v60 = vpack.c.bf16 %v917_v57, %v916_v56 }
 0x3b7   :  { %1341 = vmatmul.mubr.bf16.vlgmr.msra.gmra.mrb[12].mxu0 %v918_v60  ;;  %1384 = vmatmul.mubr.bf16.vlgmr.msra.gmra.mrb[16].mxu1 %v918_v60 }
 0x3b8   :  { %1395 = vmatpush1.bf16.msra.mxu0 %v2019_v58  ;;  %1881 = vmatpush3.bf16.msra.mxu1 %v2022_v59 }
 0x3b9   :  { %1396 = vmatprep.subr.bf16.mxu0 %v2025_v61  ;;  %1882 = vmatprep.subr.bf16.mxu1 %v2131_v43 }
 0x3ba   :  { %1426 = vmatprep.mubr.bf16.mxu0 %v2133_v48  ;;  %1896 = vmatprep.mubr.msk.bf16.mxu1 %vm2132_vm0, %v2131_v43 }
 0x3bc   :  { %1397 = vmatpush1.bf16.msra.mxu0 %v2023_v62  ;;  %1883 = vmatpush3.bf16.msra.mxu1 %v2026_v63 }
 0x3bd   :  { %1398 = vmatprep.subr.bf16.mxu0 %v2029_v0  ;;  %1884 = vmatprep.subr.bf16.mxu1 %v2131_v43 }
 0x3c0   :  { %1399 = vmatpush1.bf16.msra.mxu0 %v2027_v1  ;;  %1885 = vmatpush3.bf16.msra.mxu1 %v2030_v2 }
 0x3c1   :  { %1400 = vmatprep.subr.bf16.mxu0 %v2033_v3  ;;  %1886 = vmatprep.subr.bf16.mxu1 %v2131_v43 }
 0x3c4   :  { %1401 = vmatpush1.bf16.msra.mxu0 %v2031_v4  ;;  %1887 = vmatpush3.bf16.msra.mxu1 %v2034_v5  ;;  %v1003_v5 = vsub.s32 4, %v2652_v19 }
 0x3c5   :  { %1402 = vmatprep.subr.bf16.mxu0 %v2037_v6  ;;  %1888 = vmatprep.subr.bf16.mxu1 %v2131_v43  ;;  %v1011_v6 = vsub.s32 6, %v2652_v19 }
 0x3c8   :  { %1403 = vmatpush1.bf16.msra.mxu0 %v2035_v7  ;;  %1889 = vmatpush3.bf16.msra.mxu1 %v2038_v8  ;;  %v1007_v7 = vsub.s32 5, %v2652_v19 }
 0x3c9   :  { %1404 = vmatprep.subr.bf16.mxu0 %v2041_v9  ;;  %1890 = vmatprep.subr.bf16.mxu1 %v2131_v43 }
 0x3cc   :  { %1405 = vmatpush1.bf16.msra.mxu0 %v2039_v10  ;;  %1891 = vmatpush3.bf16.msra.mxu1 %v2042_v11  ;;  %v1004_v10 = vrot.slane %v2659_v22, %v1003_v5  ;;  %v1012_v11 = vrot.slane %v2659_v22, %v1011_v6 }
 0x3cd   :  { %1406 = vmatprep.subr.bf16.mxu0 %v2045_v12  ;;  %1892 = vmatprep.subr.bf16.mxu1 %v2131_v43 }
 0x3d0   :  { %1407 = vmatpush1.bf16.msra.mxu0 %v2043_v13  ;;  %1893 = vmatpush3.bf16.msra.mxu1 %v2046_v14  ;;  %v1008_v13 = vrot.slane %v2659_v22, %v1007_v7 }
 0x3d1   :  { %1408 = vmatprep.subr.bf16.mxu0 %v2049_v15  ;;  %1894 = vmatprep.subr.bf16.mxu1 %v2131_v43  ;;  %v999_v43 = vsub.s32 3, %v2652_v19 }
 0x3d3   :  { %v1000_v27 = vrot.slane %v2659_v22, %v999_v43 }
 0x3d4   :  { %1409 = vmatpush1.bf16.msra.mxu0 %v2047_v16  ;;  %1895 = vmatpush3.bf16.msra.mxu1 %v2050_v17 }
 0x3d7   :  { %1427 = vmatmul.mubr.bf16.vlgmr.msra.gmra.mrb[16].mxu0 %v918_v60  ;;  %1897 = vmatmul.mubr.bf16.vlgmr.msra.gmra.mrb[20].mxu1 %v918_v60 }
 0x48a   :  { %v1342_v28 = vpop.f32.mrb[12].mxu0  ;;  %v1385_v29 = vpop.f32.mrb[16].mxu1 }
 0x48b   :  { %v1343_v30 = vadd.f32 %v1342_v28, %v988_v24  ;;  %v1386_v31 = vadd.f32 %v1385_v29, %v996_v25  ;;  %v1344_v32 = vpop.f32.mrb[13].mxu0  ;;  %v1387_v33 = vpop.f32.mrb[17].mxu1 }
 0x48c   :  { %v1345_v34 = vadd.f32 %v1344_v32, %v992_v26  ;;  %v1388_v35 = vadd.f32 %v1387_v33, %v1000_v27  ;;  %v1346_v36 = vpop.f32.mrb[14].mxu0  ;;  %v1389_v37 = vpop.f32.mrb[18].mxu1 }
 0x48d   :  { %v1720_v38 = vmul.f32 -1.442695, %v1343_v30  ;;  %v1722_v39 = vmul.f32 -1.442695, %v1386_v31  ;;  %v1347_v40 = vadd.f32 %v1346_v36, %v988_v24  ;;  %v1390_v41 = vadd.f32 %v1389_v37, %v996_v25  ;;  %v1348_v42 = vpop.f32.mrb[15].mxu0  ;;  %v1391_v44 = vpop.f32.mrb[19].mxu1 }
 0x48e   :  { %v1721_v45 = vmul.f32 -1.442695, %v1345_v34  ;;  %v1723_v46 = vmul.f32 -1.442695, %v1388_v35  ;;  %v1349_v47 = vadd.f32 %v1348_v42, %v992_v26  ;;  %v1392_v48 = vadd.f32 %v1391_v44, %v1000_v27 }
 0x48f   :  { %2051 = vpow2.f32 %v1720_v38  ;;  %v1727_v49 = vmul.f32 -1.442695, %v1347_v40  ;;  %v1729_v50 = vmul.f32 -1.442695, %v1390_v41 }
 0x490   :  { %2053 = vpow2.f32 %v1722_v39  ;;  %v1728_v51 = vmul.f32 -1.442695, %v1349_v47  ;;  %v1730_v52 = vmul.f32 -1.442695, %v1392_v48 }
 0x491   :  { %2055 = vpow2.f32 %v1721_v45 }
 0x492   :  { %2057 = vpow2.f32 %v1723_v46 }
 0x493   :  { %2059 = vpow2.f32 %v1727_v49 }
 0x494   :  { %2061 = vpow2.f32 %v1729_v50 }
 0x495   :  { %2063 = vpow2.f32 %v1728_v51 }
 0x496   :  { %2065 = vpow2.f32 %v1730_v52 }
 0x499   :  { %v2052_v53 = vpop.eup %2051 }
 0x49a   :  { %v2054_v54 = vpop.eup %2053  ;;  %v1520_v55 = vadd.f32 1.0, %v2052_v53 }
 0x49b   :  { %v2056_v56 = vpop.eup %2055  ;;  %v1522_v57 = vadd.f32 1.0, %v2054_v54 }
 0x49c   :  { %v2058_v58 = vpop.eup %2057  ;;  %2067 = vrcp.f32 %v1520_v55  ;;  %v1521_v59 = vadd.f32 1.0, %v2056_v56 }
 0x49d   :  { %v2060_v60 = vpop.eup %2059  ;;  %2069 = vrcp.f32 %v1522_v57  ;;  %v1523_v61 = vadd.f32 1.0, %v2058_v58 }
 0x49e   :  { %v2062_v62 = vpop.eup %2061  ;;  %2071 = vrcp.f32 %v1521_v59  ;;  %v1527_v63 = vadd.f32 1.0, %v2060_v60 }
 0x49f   :  { %v2064_v0 = vpop.eup %2063  ;;  %2073 = vrcp.f32 %v1523_v61  ;;  %v1529_v1 = vadd.f32 1.0, %v2062_v62 }
 0x4a0   :  { %v2066_v2 = vpop.eup %2065  ;;  %2075 = vrcp.f32 %v1527_v63  ;;  %v1528_v3 = vadd.f32 1.0, %v2064_v0 }
 0x4a1   :  { %2077 = vrcp.f32 %v1529_v1  ;;  %v1530_v4 = vadd.f32 1.0, %v2066_v2 }
 0x4a2   :  { %2079 = vrcp.f32 %v1528_v3 }
 0x4a3   :  { %2081 = vrcp.f32 %v1530_v4 }
 0x4a6   :  { %v2068_v8 = vpop.eup %2067 }
 0x4a7   :  { %v2070_v9 = vpop.eup %2069  ;;  %1562 = vst [vmem:[#allocation2] sm:$0xff] %v2068_v8 }
 0x4a8   :  { %v2072_v12 = vpop.eup %2071  ;;  %1564 = vst [vmem:[#allocation2 + $0x10] sm:$0xff] %v2070_v9 }
 0x4a9   :  { %v2074_v14 = vpop.eup %2073  ;;  %1563 = vst [vmem:[#allocation2 + $0x8] sm:$0xff] %v2072_v12 }
 0x4aa   :  { %v2076_v15 = vpop.eup %2075  ;;  %1565 = vst [vmem:[#allocation2 + $0x18] sm:$0xff] %v2074_v14  ;;  %v1428_v16 = vpop.f32.mrb[16].mxu0 }
 0x4ab   :  { %v1471_v17 = vpop.f32.mrb[20].mxu1  ;;  %v2078_v18 = vpop.eup %2077  ;;  %1569 = vst [vmem:[#allocation2 + $0x38] sm:$0xff] %v2076_v15  ;;  %v1429_v19 = vadd.f32 %v1428_v16, %v1004_v10 }
 0x4ac   :  { %v1472_v20 = vadd.f32 %v1471_v17, %v1012_v11  ;;  %v1430_v21 = vpop.f32.mrb[17].mxu0  ;;  %v1898_v23 = vpop.f32.mrb[21].mxu1  ;;  %1571 = vst [vmem:[#allocation2 + $0x48] sm:$0xff] %v2078_v18 }
 0x4ad   :  { %v2080_v43 = vpop.eup %2079  ;;  %v1431_v24 = vadd.f32 %v1430_v21, %v1008_v13  ;;  %v1432_v25 = vpop.f32.mrb[18].mxu0  ;;  %v1724_v22 = vmul.f32 -1.442695, %v1429_v19 }
 0x4ae   :  { %v1474_v26 = vpop.f32.mrb[22].mxu1  ;;  %v2082_v27 = vpop.eup %2081  ;;  %1570 = vst [vmem:[#allocation2 + $0x40] sm:$0xff] %v2080_v43  ;;  %v1726_v28 = vmul.f32 -1.442695, %v1472_v20  ;;  %v1433_v29 = vadd.f32 %v1432_v25, %v1004_v10 }
 0x4af   :  { %v1475_v30 = vadd.f32 %v1474_v26, %v1012_v11  ;;  %v1434_v31 = vpop.f32.mrb[19].mxu0  ;;  %v1899_v32 = vpop.f32.mrb[23].mxu1  ;;  %1572 = vst [vmem:[#allocation2 + $0x50] sm:$0xff] %v2082_v27  ;;  %v1725_v33 = vmul.f32 -1.442695, %v1431_v24  ;;  %2083 = vpow2.f32 %v1724_v22 }
 0x4b0   :  { %v1435_v34 = vadd.f32 %v1434_v31, %v1008_v13  ;;  %v1731_v35 = vmul.f32 -1.442695, %v1433_v29  ;;  %2085 = vpow2.f32 %v1726_v28 }
 0x4b1   :  { %v1733_v36 = vmul.f32 -1.442695, %v1475_v30  ;;  %2087 = vpow2.f32 %v1725_v33 }
 0x4b2   :  { %v1732_v37 = vmul.f32 -1.442695, %v1435_v34  ;;  %2089 = vpow2.f32 %v1731_v35 }
 0x4b3   :  { %2091 = vpow2.f32 %v1733_v36 }
 0x4b4   :  { %2093 = vpow2.f32 %v1732_v37 }
 0x4b9   :  { %v2084_v38 = vpop.eup %2083 }
 0x4ba   :  { %v2086_v39 = vpop.eup %2085  ;;  %v1524_v40 = vadd.f32 1.0, %v2084_v38 }
 0x4bb   :  { %v2088_v41 = vpop.eup %2087  ;;  %v1526_v42 = vadd.f32 1.0, %v2086_v39 }
 0x4bc   :  { %v2090_v44 = vpop.eup %2089  ;;  %2095 = vrcp.f32 %v1524_v40  ;;  %v1525_v45 = vadd.f32 1.0, %v2088_v41 }
 0x4bd   :  { %v2092_v46 = vpop.eup %2091  ;;  %2097 = vrcp.f32 %v1526_v42  ;;  %v1531_v47 = vadd.f32 1.0, %v2090_v44 }
 0x4be   :  { %v2094_v48 = vpop.eup %2093  ;;  %2099 = vrcp.f32 %v1525_v45  ;;  %v1533_v49 = vadd.f32 1.0, %v2092_v46 }
 0x4bf   :  { %2101 = vrcp.f32 %v1531_v47  ;;  %v1532_v50 = vadd.f32 1.0, %v2094_v48 }
 0x4c0   :  { %2103 = vrcp.f32 %v1533_v49 }
 0x4c1   :  { %2105 = vrcp.f32 %v1532_v50 }
 0x4c6   :  { %v2096_v51 = vpop.eup %2095 }
 0x4c7   :  { %v2098_v52 = vpop.eup %2097  ;;  %1566 = vst [vmem:[#allocation2 + $0x20] sm:$0xff] %v2096_v51 }
 0x4c8   :  { %v2100_v53 = vpop.eup %2099  ;;  %1568 = vst.msk [vmem:[#allocation2 + $0x30] sm:$0xff] %vm460_vm1, %v2098_v52 }
 0x4c9   :  { %v2102_v54 = vpop.eup %2101  ;;  %1567 = vst [vmem:[#allocation2 + $0x28] sm:$0xff] %v2100_v53 }
 0x4ca   :  { %v2104_v55 = vpop.eup %2103  ;;  %1573 = vst [vmem:[#allocation2 + $0x58] sm:$0xff] %v2102_v54 }
 0x4cb   :  { %v2106_v56 = vpop.eup %2105  ;;  %1575 = vst.msk [vmem:[#allocation2 + $0x68] sm:$0xff] %vm460_vm1, %v2104_v55 }
 0x4cc   :  { %1574 = vst [vmem:[#allocation2 + $0x60] sm:$0xff] %v2106_v56 }
 0x4cd   :  { %2118 = shalt.err (!%p2115_p4)
}
 0x4ce   :  { %s2119_s3 = scalar_lea.hbm %s2698_s11, 1792 }
 0x4cf   :  { %p2120_p5 = scmp.ne.s32.totalorder %s2698_s11, %s2119_s3  ;;  %p2123_p6 = scmp.lt.u32.totalorder %s2119_s3, %s2698_s11 }
 0x4d1   :  { %p2125_p7 = pnand %p2123_p6, %p2120_p5 }
 0x4d3   :  { %2128 = shalt.err (!%p2125_p7)
}
 0x4d4   :  { %s2135_s12 = smov 896   ;;  %s2136_s0 = smov 56  }
 0x4d5   :  { %1587 = dma.vmem_to_hbm [thread:$0]  %s1582_s10, 1792, %s2698_s11, [#allocation3], %s2135_s12, %s2135_s12, %s2136_s0  }
 0x4d6   :  { %2129 = dma.done.wait [#allocation3], 1792  }
 0x4d7   :  { %2130 = vsyncadd [#allocation3], 4294965504 }
 0x4d8   :  { %1591 = vsyncpa [#allocation3], 1 }

</bundles_post_ra>
